<compile_context>
chip_gen: v5e
topology: v5e:2x2
jax: 0.10.0
libtpu: 0.0.40
codegen_flags: <defaults>
</compile_context>

<pallas_src>
import functools

import jax
import jax.numpy as jnp
from jax.experimental import pallas as pl
from jax.experimental.pallas import tpu as pltpu


# ----------------------------------------------------------------------------
# Fused whole-graph kernel (grid-less): everything lives in VMEM.
# ----------------------------------------------------------------------------
def _fused_gcn_kernel(a_ref, x_ref, w1_ref, b1_ref, w2_ref, b2_ref, o_ref):
    cdt = a_ref.dtype  # compute dtype of the MXU operands (fp32 or bf16)
    a = a_ref[...]
    # layer 1: feature transform, aggregation, bias, ReLU (epilogue in fp32)
    xw1 = jnp.dot(x_ref[...], w1_ref[...], preferred_element_type=jnp.float32)
    h = jnp.dot(a, xw1.astype(cdt), preferred_element_type=jnp.float32)
    h = jnp.maximum(h + b1_ref[...], 0.0).astype(cdt)
    # layer 2: feature transform, aggregation, bias
    hw2 = jnp.dot(h, w2_ref[...], preferred_element_type=jnp.float32)
    out = jnp.dot(a, hw2.astype(cdt), preferred_element_type=jnp.float32)
    o_ref[...] = (out + b2_ref[...]).astype(o_ref.dtype)


def _fused_gcn(a_p, x_p, w1_p, b1_p, w2_p, b2_p):
    n_p = a_p.shape[0]
    fin_p = x_p.shape[1]
    hid_p = w1_p.shape[1]
    out_p = w2_p.shape[1]
    flops = 2 * (n_p * fin_p * hid_p + n_p * n_p * hid_p
                 + n_p * hid_p * out_p + n_p * n_p * out_p)
    bytes_accessed = (sum(int(t.size) * t.dtype.itemsize
                          for t in (a_p, x_p, w1_p, b1_p, w2_p, b2_p))
                      + n_p * out_p * 4)
    return pl.pallas_call(
        _fused_gcn_kernel,
        out_shape=jax.ShapeDtypeStruct((n_p, out_p), jnp.float32),
        compiler_params=pltpu.CompilerParams(
            vmem_limit_bytes=32 * 1024 * 1024),
        cost_estimate=pl.CostEstimate(
            flops=flops, transcendentals=0, bytes_accessed=bytes_accessed),
    )(a_p, x_p, w1_p, b1_p, w2_p, b2_p)


# ----------------------------------------------------------------------------
# Generic tiled matmul + (bias, optional ReLU) epilogue kernel (large graphs).
# ----------------------------------------------------------------------------
def _matmul_bias_kernel(apply_relu, a_ref, b_ref, bias_ref, o_ref, acc_ref):
    k = pl.program_id(2)

    @pl.when(k == 0)
    def _():
        acc_ref[...] = jnp.zeros_like(acc_ref)

    acc_ref[...] += jnp.dot(a_ref[...], b_ref[...],
                            preferred_element_type=jnp.float32)

    @pl.when(k == pl.num_programs(2) - 1)
    def _():
        # fp32 epilogue on the accumulator, single lane-dense (tn=128) store.
        r = acc_ref[...] + bias_ref[...].astype(jnp.float32)
        if apply_relu:
            r = jnp.maximum(r, 0.0)
        o_ref[...] = r.astype(o_ref.dtype)


def _tiled_matmul(a, b, bias, *, apply_relu, out_dtype, tm, tn, tk):
    """out = a @ b + bias (optionally ReLU'd). All dims must be tile-aligned."""
    m, k_dim = a.shape
    k2, n = b.shape
    assert k_dim == k2
    assert m % tm == 0 and n % tn == 0 and k_dim % tk == 0

    grid = (m // tm, n // tn, k_dim // tk)
    flops = 2 * m * n * k_dim
    bytes_accessed = (m * k_dim * a.dtype.itemsize
                      + k_dim * n * b.dtype.itemsize
                      + m * n * jnp.dtype(out_dtype).itemsize)

    return pl.pallas_call(
        functools.partial(_matmul_bias_kernel, apply_relu),
        out_shape=jax.ShapeDtypeStruct((m, n), out_dtype),
        grid_spec=pltpu.PrefetchScalarGridSpec(
            num_scalar_prefetch=0,
            grid=grid,
            in_specs=[
                pl.BlockSpec((tm, tk), lambda i, j, k: (i, k)),
                pl.BlockSpec((tk, tn), lambda i, j, k: (k, j)),
                pl.BlockSpec((1, tn), lambda i, j, k: (0, j)),
            ],
            out_specs=pl.BlockSpec((tm, tn), lambda i, j, k: (i, j)),
            scratch_shapes=[pltpu.VMEM((tm, tn), jnp.float32)],
        ),
        compiler_params=pltpu.CompilerParams(
            dimension_semantics=("parallel", "parallel", "arbitrary"),
            vmem_limit_bytes=32 * 1024 * 1024,
        ),
        cost_estimate=pl.CostEstimate(
            flops=flops, transcendentals=0, bytes_accessed=bytes_accessed),
    )(a, b, bias)


# ----------------------------------------------------------------------------
# GCN forward (two GCNConv layers with ReLU in between).
# ----------------------------------------------------------------------------
def _round_up(x, m):
    return ((x + m - 1) // m) * m


def _pad2d(a, rows, cols, dtype):
    a = a.astype(dtype)
    pr, pc = rows - a.shape[0], cols - a.shape[1]
    if pr or pc:
        a = jnp.pad(a, ((0, pr), (0, pc)))
    return a


def _fused_vmem_bytes(n_p, fin_p, hid_p, out_p, itemsize):
    in_bytes = (n_p * n_p + n_p * fin_p + fin_p * hid_p + hid_p * out_p) * itemsize
    inter = (2 * n_p * hid_p + n_p * out_p) * 4        # fp32 intermediates
    out_bytes = n_p * out_p * 4
    bias = (hid_p + out_p) * 4
    return in_bytes + inter + out_bytes + bias


@functools.partial(jax.jit, static_argnames=("compute_dtype", "force_tiled"))
def gcn_forward_pallas(a_hat, x, w1, b1, w2, b2, *,
                       compute_dtype=jnp.float32, force_tiled=False):
    """2-layer GCN:  relu(A_hat @ (X @ W1) + b1) -> A_hat @ (H @ W2) + b2.

    compute_dtype=jnp.float32 matches PyTorch exactly; jnp.bfloat16 halves
    HBM traffic for A_hat and uses the bf16 MXU path (fp32 accumulation).
    """
    n, fin = x.shape
    hid = w1.shape[1]
    out_c = w2.shape[1]

    # Lane (last) dims padded to 128; node dim padded to the row/K tile.
    # Zero padding is semantically inert: padded A_hat columns are zero, so
    # padded rows never leak into real rows.
    t_node = min(256, _round_up(n, 128))
    t_lane = 128
    n_p = _round_up(n, t_node)
    fin_p = _round_up(fin, t_lane)
    hid_p = _round_up(hid, t_lane)
    out_p = _round_up(out_c, t_lane)

    cdt = jnp.dtype(compute_dtype)
    a_p = _pad2d(a_hat, n_p, n_p, cdt)
    x_p = _pad2d(x, n_p, fin_p, cdt)
    w1_p = _pad2d(w1, fin_p, hid_p, cdt)
    w2_p = _pad2d(w2, hid_p, out_p, cdt)
    b1_p = _pad2d(b1.reshape(1, -1), 1, hid_p, jnp.float32)
    b2_p = _pad2d(b2.reshape(1, -1), 1, out_p, jnp.float32)

    fused_bytes = _fused_vmem_bytes(n_p, fin_p, hid_p, out_p, cdt.itemsize)
    use_fused = (not force_tiled) and fused_bytes <= 20 * 1024 * 1024

    if use_fused:
        # Single pallas_call: no HBM round-trips for intermediates.
        out = _fused_gcn(a_p, x_p, w1_p, b1_p, w2_p, b2_p)
        return out[:n, :out_c]

    # Large-graph path: tiled matmuls; feature transforms are factored out of
    # the NxN aggregation so the dominant grid is pure MXU work.
    zero_hid = jnp.zeros((1, hid_p), jnp.float32)
    zero_out = jnp.zeros((1, out_p), jnp.float32)

    xw1 = _tiled_matmul(x_p, w1_p, zero_hid, apply_relu=False,
                        out_dtype=cdt, tm=t_node, tn=t_lane, tk=t_lane)
    h = _tiled_matmul(a_p, xw1, b1_p, apply_relu=True,
                      out_dtype=cdt, tm=t_node, tn=t_lane, tk=t_node)
    hw2 = _tiled_matmul(h, w2_p, zero_out, apply_relu=False,
                        out_dtype=cdt, tm=t_node, tn=t_lane, tk=t_lane)
    out = _tiled_matmul(a_p, hw2, b2_p, apply_relu=False,
                        out_dtype=jnp.float32, tm=t_node, tn=t_lane, tk=t_node)

    # TODO(synk): for batches of many tiny graphs, batch them (block-diagonal
    # A_hat or a leading batch grid axis) to amortize per-call overhead.
    return out[:n, :out_c]


# ----------------------------------------------------------------------------
# Graph preprocessing (plain JAX — scatter/index glue, not a Pallas hot path).
# ----------------------------------------------------------------------------
def build_normalized_adjacency(edge_index, num_nodes):
    """A_hat = D^{-1/2} (A + I) D^{-1/2}, matching GCNConv's default norm."""
    src = edge_index[0]
    dst = edge_index[1]
    a = jnp.zeros((num_nodes, num_nodes), jnp.float32)
    # message flows src -> dst, aggregated at dst; duplicates are summed
    # (matches PyG GCNConv's message accumulation).
    a = a.at[dst, src].add(1.0)
    a = a + jnp.eye(num_nodes, dtype=jnp.float32)  # add self-loops
    deg = a.sum(axis=1)
    d_inv_sqrt = jnp.where(deg > 0.0, 1.0 / jnp.sqrt(deg), 0.0)
    return d_inv_sqrt[:, None] * a * d_inv_sqrt[None, :]


def gcn_reference(a_hat, x, w1, b1, w2, b2):
    h = a_hat @ (x @ w1) + b1
    h = jnp.maximum(h, 0.0)
    return a_hat @ (h @ w2) + b2


if __name__ == "__main__":
    # Small synthetic graph consistent with the module's forward:
    #   data.x: [N, in_channels], data.edge_index: [2, E]
    num_nodes = 16
    in_channels = 8
    hidden_channels = 32
    out_channels = 16
    num_edges = 40

    key = jax.random.PRNGKey(0)
    k_x, k_src, k_dst, k_w1, k_w2 = jax.random.split(key, 5)

    x = jax.random.normal(k_x, (num_nodes, in_channels), dtype=jnp.float32)

    # random directed edges (no self-loops; A_hat builder adds them)
    src = jax.random.randint(k_src, (num_edges,), 0, num_nodes, dtype=jnp.int32)
    dst = jax.random.randint(k_dst, (num_edges,), 0, num_nodes, dtype=jnp.int32)
    dst = jnp.where(dst == src, (dst + 1) % num_nodes, dst)
    edge_index = jnp.stack([src, dst], axis=0)  # [2, E]

    # Glorot-ish weights, zero biases (like PyG GCNConv defaults).
    def glorot(k, shape):
        fan_in, fan_out = shape
        scale = jnp.sqrt(6.0 / (fan_in + fan_out))
        return jax.random.uniform(k, shape, jnp.float32, -scale, scale)

    w1 = glorot(k_w1, (in_channels, hidden_channels))
    b1 = jnp.zeros((1, hidden_channels), jnp.float32)
    w2 = glorot(k_w2, (hidden_channels, out_channels))
    b2 = jnp.zeros((1, out_channels), jnp.float32)

    a_hat = build_normalized_adjacency(edge_index, num_nodes)
    ref = gcn_reference(a_hat, x, w1, b1, w2, b2)

    # 1) fused fp32 path — matches the PyTorch module's semantics.
    out = gcn_forward_pallas(a_hat, x, w1, b1, w2, b2)
    out = jax.block_until_ready(out)
    assert out.shape == (num_nodes, out_channels)
    assert jnp.allclose(out, ref, atol=1e-3, rtol=1e-3), \
        float(jnp.max(jnp.abs(out - ref)))

    # 2) tiled fallback path (large-graph code path), forced on the same graph.
    out_t = gcn_forward_pallas(a_hat, x, w1, b1, w2, b2, force_tiled=True)
    out_t = jax.block_until_ready(out_t)
    assert out_t.shape == (num_nodes, out_channels)
    assert jnp.allclose(out_t, ref, atol=1e-3, rtol=1e-3), \
        float(jnp.max(jnp.abs(out_t - ref)))

    # 3) bf16 operand path (fp32 accumulation) — throughput option.
    out_bf16 = gcn_forward_pallas(a_hat, x, w1, b1, w2, b2,
                                  compute_dtype=jnp.bfloat16)
    out_bf16 = jax.block_until_ready(out_bf16)
    assert out_bf16.shape == (num_nodes, out_channels)
    assert bool(jnp.all(jnp.isfinite(out_bf16)))
    assert float(jnp.max(jnp.abs(out_bf16.astype(jnp.float32) - ref))) < 0.5

    print("KERNEL_OK")
</pallas_src>

<mosaic_0001>
module attributes {stable_mosaic.version = 11 : i64} {
  func.func @_fused_gcn_kernel(%arg0: memref<128x128xf32, #tpu.memory_space<vmem>>, %arg1: memref<128x128xf32, #tpu.memory_space<vmem>>, %arg2: memref<128x128xf32, #tpu.memory_space<vmem>>, %arg3: memref<1x128xf32, #tpu.memory_space<vmem>>, %arg4: memref<128x128xf32, #tpu.memory_space<vmem>>, %arg5: memref<1x128xf32, #tpu.memory_space<vmem>>, %arg6: memref<128x128xf32, #tpu.memory_space<vmem>>) attributes {dimension_semantics = [], scalar_prefetch = 0 : i64, scratch_operands = 0 : i64, tpu.core_type = #tpu.core_type<tc>} {
    %c0 = arith.constant 0 : index
    %c0_0 = arith.constant 0 : index
    %0 = vector.load %arg0[%c0, %c0_0] : memref<128x128xf32, #tpu.memory_space<vmem>>, vector<128x128xf32>
    %c0_1 = arith.constant 0 : index
    %c0_2 = arith.constant 0 : index
    %1 = vector.load %arg1[%c0_1, %c0_2] : memref<128x128xf32, #tpu.memory_space<vmem>>, vector<128x128xf32>
    %c0_3 = arith.constant 0 : index
    %c0_4 = arith.constant 0 : index
    %2 = vector.load %arg2[%c0_3, %c0_4] : memref<128x128xf32, #tpu.memory_space<vmem>>, vector<128x128xf32>
    %cst = arith.constant dense<0.000000e+00> : vector<128x128xf32>
    %3 = tpu.matmul %1, %2, %cst {dimension_numbers = #tpu.dot_dimension_numbers<[1], [0], [0], [1], [0, 0, 1, 1], [], []>} : vector<128x128xf32>, vector<128x128xf32>, vector<128x128xf32> -> vector<128x128xf32>
    %cst_5 = arith.constant dense<0.000000e+00> : vector<128x128xf32>
    %4 = tpu.matmul %0, %3, %cst_5 {dimension_numbers = #tpu.dot_dimension_numbers<[1], [0], [0], [1], [0, 0, 1, 1], [], []>} : vector<128x128xf32>, vector<128x128xf32>, vector<128x128xf32> -> vector<128x128xf32>
    %c0_6 = arith.constant 0 : index
    %c0_7 = arith.constant 0 : index
    %5 = vector.load %arg3[%c0_6, %c0_7] : memref<1x128xf32, #tpu.memory_space<vmem>>, vector<1x128xf32>
    %6 = vector.broadcast %5 : vector<1x128xf32> to vector<128x128xf32>
    %7 = arith.addf %4, %6 : vector<128x128xf32>
    %cst_8 = arith.constant 0.000000e+00 : f32
    %8 = vector.broadcast %cst_8 : f32 to vector<128x128xf32>
    %9 = arith.maximumf %7, %8 : vector<128x128xf32>
    %c0_9 = arith.constant 0 : index
    %c0_10 = arith.constant 0 : index
    %10 = vector.load %arg4[%c0_9, %c0_10] : memref<128x128xf32, #tpu.memory_space<vmem>>, vector<128x128xf32>
    %cst_11 = arith.constant dense<0.000000e+00> : vector<128x128xf32>
    %11 = tpu.matmul %9, %10, %cst_11 {dimension_numbers = #tpu.dot_dimension_numbers<[1], [0], [0], [1], [0, 0, 1, 1], [], []>} : vector<128x128xf32>, vector<128x128xf32>, vector<128x128xf32> -> vector<128x128xf32>
    %cst_12 = arith.constant dense<0.000000e+00> : vector<128x128xf32>
    %12 = tpu.matmul %0, %11, %cst_12 {dimension_numbers = #tpu.dot_dimension_numbers<[1], [0], [0], [1], [0, 0, 1, 1], [], []>} : vector<128x128xf32>, vector<128x128xf32>, vector<128x128xf32> -> vector<128x128xf32>
    %c0_13 = arith.constant 0 : index
    %c0_14 = arith.constant 0 : index
    %13 = vector.load %arg5[%c0_13, %c0_14] : memref<1x128xf32, #tpu.memory_space<vmem>>, vector<1x128xf32>
    %14 = vector.broadcast %13 : vector<1x128xf32> to vector<128x128xf32>
    %15 = arith.addf %12, %14 : vector<128x128xf32>
    %c0_15 = arith.constant 0 : index
    %c0_16 = arith.constant 0 : index
    %16 = vector.load %arg6[%c0_15, %c0_16] : memref<128x128xf32, #tpu.memory_space<vmem>>, vector<128x128xf32>
    tpu.vector_store %arg6[%c0_15, %c0_16], %15 {strides = array<i32>} : memref<128x128xf32, #tpu.memory_space<vmem>>, vector<128x128xf32>,
    return
  }
}

</mosaic_0001>

<bundles_post_ra>
// kernel: gcn_forward_pallas.1
= control target key start
LH: loop header
LB: loop body
LE: loop exit
PB: predicated region body
PF: predicated region fallthrough
CT: control target
= control target key end

     0   :  { %s738_s2 = inlined_call_operand.vmem [shape: f32[128,128], index: 2, kind: input, shape index: {}]   ;;  %s739_s1 = inlined_call_operand.vmem [shape: f32[128,128], index: 1, kind: input, shape index: {}]   ;;  %s740_s3 = inlined_call_operand.vmem [shape: f32[1,128], index: 3, kind: input, shape index: {}]   ;;  %s741_s0 = inlined_call_operand.vmem [shape: f32[128,128], index: 0, kind: input, shape index: {}]   ;;  %s742_s4 = inlined_call_operand.vmem [shape: f32[128,128], index: 4, kind: input, shape index: {}]   ;;  %s743_s5 = inlined_call_operand.vmem [shape: f32[1,128], index: 5, kind: input, shape index: {}]   ;;  %s744_s6 = inlined_call_operand.vmem [shape: f32[128,128], index: 6, kind: output, shape index: {}]  }
   0x1   :  { %v70_v0 = vld [vmem:[%s738_s2 + $0x78] sm:$0xff]  ;;  %v69_v1 = vld [vmem:[%s738_s2 + $0x70] sm:$0xff]  ;;  %v68_v2 = vld [vmem:[%s738_s2 + $0x68] sm:$0xff] }
   0x2   :  { %71 = vmatpush.msra.mxu0 %v70_v0  ;;  %v67_v3 = vld [vmem:[%s738_s2 + $0x60] sm:$0xff]  ;;  %v66_v4 = vld [vmem:[%s738_s2 + $0x58] sm:$0xff]  ;;  %v65_v5 = vld [vmem:[%s738_s2 + $0x50] sm:$0xff] }
   0x3   :  { %v64_v6 = vld [vmem:[%s738_s2 + $0x48] sm:$0xff]  ;;  %v63_v7 = vld [vmem:[%s738_s2 + $0x40] sm:$0xff]  ;;  %v62_v8 = vld [vmem:[%s738_s2 + $0x38] sm:$0xff] }
   0x4   :  { %72 = vmatpush.msra.mxu0 %v69_v1  ;;  %v61_v9 = vld [vmem:[%s738_s2 + $0x30] sm:$0xff]  ;;  %v60_v10 = vld [vmem:[%s738_s2 + $0x28] sm:$0xff]  ;;  %v59_v11 = vld [vmem:[%s738_s2 + $0x20] sm:$0xff] }
   0x5   :  { %v58_v12 = vld [vmem:[%s738_s2 + $0x18] sm:$0xff]  ;;  %v57_v13 = vld [vmem:[%s738_s2 + $0x10] sm:$0xff]  ;;  %v56_v14 = vld [vmem:[%s738_s2 + $0x8] sm:$0xff] }
   0x6   :  { %73 = vmatpush.msra.mxu0 %v68_v2  ;;  %v55_v15 = vld [vmem:[%s738_s2] sm:$0xff]  ;;  %v40_v17 = vld [vmem:[%s739_s1 + $0x8] sm:$0xff]  ;;  %v41_v18 = vld [vmem:[%s739_s1 + $0x10] sm:$0xff] }
   0x7   :  { %v39_v16 = vld [vmem:[%s739_s1] sm:$0xff]  ;;  %v42_v19 = vld [vmem:[%s739_s1 + $0x18] sm:$0xff]  ;;  %v44_v21 = vld [vmem:[%s739_s1 + $0x28] sm:$0xff] }
   0x8   :  { %74 = vmatpush.msra.mxu0 %v67_v3  ;;  %v43_v20 = vld [vmem:[%s739_s1 + $0x20] sm:$0xff]  ;;  %v45_v22 = vld [vmem:[%s739_s1 + $0x30] sm:$0xff]  ;;  %v46_v23 = vld [vmem:[%s739_s1 + $0x38] sm:$0xff] }
   0x9   :  { %v47_v24 = vld [vmem:[%s739_s1 + $0x40] sm:$0xff]  ;;  %v48_v25 = vld [vmem:[%s739_s1 + $0x48] sm:$0xff]  ;;  %v49_v26 = vld [vmem:[%s739_s1 + $0x50] sm:$0xff] }
   0xa   :  { %75 = vmatpush.msra.mxu0 %v66_v4  ;;  %v50_v27 = vld [vmem:[%s739_s1 + $0x58] sm:$0xff]  ;;  %v51_v28 = vld [vmem:[%s739_s1 + $0x60] sm:$0xff]  ;;  %v52_v29 = vld [vmem:[%s739_s1 + $0x68] sm:$0xff] }
   0xb   :  { %v53_v30 = vld [vmem:[%s739_s1 + $0x70] sm:$0xff]  ;;  %v54_v31 = vld [vmem:[%s739_s1 + $0x78] sm:$0xff]  ;;  %v527_v48 = vld [vmem:[%s741_s0] sm:$0xff] }
   0xc   :  { %76 = vmatpush.msra.mxu0 %v65_v5  ;;  %v533_v49 = vld [vmem:[%s741_s0 + $0x8] sm:$0xff]  ;;  %v539_v50 = vld [vmem:[%s741_s0 + $0x10] sm:$0xff]  ;;  %v545_v51 = vld [vmem:[%s741_s0 + $0x18] sm:$0xff] }
   0xd   :  { %v551_v52 = vld [vmem:[%s741_s0 + $0x20] sm:$0xff]  ;;  %v557_v53 = vld [vmem:[%s741_s0 + $0x28] sm:$0xff]  ;;  %v563_v54 = vld [vmem:[%s741_s0 + $0x30] sm:$0xff] }
   0xe   :  { %77 = vmatpush.msra.mxu0 %v64_v6  ;;  %v569_v55 = vld [vmem:[%s741_s0 + $0x38] sm:$0xff]  ;;  %v575_v56 = vld [vmem:[%s741_s0 + $0x40] sm:$0xff]  ;;  %v235_v58 = vld [vmem:[%s742_s4 + $0x70] sm:$0xff] }
   0xf   :  { %v236_v57 = vld [vmem:[%s742_s4 + $0x78] sm:$0xff]  ;;  %v234_v59 = vld [vmem:[%s742_s4 + $0x68] sm:$0xff]  ;;  %v233_v61 = vld [vmem:[%s742_s4 + $0x60] sm:$0xff] }
  0x10   :  { %78 = vmatpush.msra.mxu0 %v63_v7  ;;  %237 = vmatpush.msra.mxu2 %v236_v57  ;;  %v590_v60 = vld [vmem:[%s741_s0 + $0x48] sm:$0xff]  ;;  %v232_v62 = vld [vmem:[%s742_s4 + $0x58] sm:$0xff]  ;;  %v231_v63 = vld [vmem:[%s742_s4 + $0x50] sm:$0xff] }
  0x11   :  { %v230_v0 = vld [vmem:[%s742_s4 + $0x48] sm:$0xff]  ;;  %v608_v1 = vld [vmem:[%s741_s0 + $0x50] sm:$0xff]  ;;  %v229_v2 = vld [vmem:[%s742_s4 + $0x40] sm:$0xff] }
  0x12   :  { %79 = vmatpush.msra.mxu0 %v62_v8  ;;  %238 = vmatpush.msra.mxu2 %v235_v58  ;;  %v228_v3 = vld [vmem:[%s742_s4 + $0x38] sm:$0xff]  ;;  %v227_v4 = vld [vmem:[%s742_s4 + $0x30] sm:$0xff]  ;;  %v226_v5 = vld [vmem:[%s742_s4 + $0x28] sm:$0xff] }
  0x13   :  { %v626_v6 = vld [vmem:[%s741_s0 + $0x58] sm:$0xff]  ;;  %v225_v7 = vld [vmem:[%s742_s4 + $0x20] sm:$0xff] }
  0x14   :  { %80 = vmatpush.msra.mxu0 %v61_v9  ;;  %239 = vmatpush.msra.mxu2 %v234_v59  ;;  %v224_v8 = vld [vmem:[%s742_s4 + $0x18] sm:$0xff]  ;;  %v223_v9 = vld [vmem:[%s742_s4 + $0x10] sm:$0xff] }
  0x16   :  { %81 = vmatpush.msra.mxu0 %v60_v10  ;;  %240 = vmatpush.msra.mxu2 %v233_v61  ;;  %v641_v10 = vld [vmem:[%s741_s0 + $0x60] sm:$0xff] }
  0x18   :  { %82 = vmatpush.msra.mxu0 %v59_v11  ;;  %241 = vmatpush.msra.mxu2 %v232_v62  ;;  %v222_v11 = vld [vmem:[%s742_s4 + $0x8] sm:$0xff] }
  0x1a   :  { %83 = vmatpush.msra.mxu0 %v58_v12  ;;  %242 = vmatpush.msra.mxu2 %v231_v63  ;;  %v221_v12 = vld [vmem:[%s742_s4] sm:$0xff] }
  0x1c   :  { %84 = vmatpush.msra.mxu0 %v57_v13  ;;  %243 = vmatpush.msra.mxu2 %v230_v0  ;;  %v653_v13 = vld [vmem:[%s741_s0 + $0x68] sm:$0xff] }
  0x1e   :  { %85 = vmatpush.msra.mxu0 %v56_v14  ;;  %244 = vmatpush.msra.mxu2 %v229_v2  ;;  %v659_v14 = vld [vmem:[%s741_s0 + $0x70] sm:$0xff] }
  0x20   :  { %86 = vmatpush.msra.mxu0 %v55_v15  ;;  %245 = vmatpush.msra.mxu2 %v228_v3  ;;  %v665_v15 = vld [vmem:[%s741_s0 + $0x78] sm:$0xff] }
  0x21   :  { %87 = vmatmul.f32.vlgmr.msra.gmra.mxu0 %v39_v16  ;;  %v391_v16 = vld [vmem:[%s740_s3] ss:$0 sm:$0xff] }
  0x22   :  { %246 = vmatpush.msra.mxu2 %v227_v4 }
  0x24   :  { %247 = vmatpush.msra.mxu2 %v226_v5 }
  0x26   :  { %248 = vmatpush.msra.mxu2 %v225_v7 }
  0x28   :  { %249 = vmatpush.msra.mxu2 %v224_v8 }
  0x29   :  { %90 = vmatmul.f32.gmra.mxu0 %v40_v17 }
  0x2a   :  { %250 = vmatpush.msra.mxu2 %v223_v9 }
  0x2c   :  { %251 = vmatpush.msra.mxu2 %v222_v11 }
  0x2e   :  { %252 = vmatpush.msra.mxu2 %v221_v12 }
  0x31   :  { %93 = vmatmul.f32.gmra.mxu0 %v41_v18 }
  0x39   :  { %96 = vmatmul.f32.gmra.mxu0 %v42_v19 }
  0x41   :  { %99 = vmatmul.f32.gmra.mxu0 %v43_v20 }
  0x49   :  { %102 = vmatmul.f32.gmra.mxu0 %v44_v21 }
  0x51   :  { %105 = vmatmul.f32.gmra.mxu0 %v45_v22 }
  0x59   :  { %108 = vmatmul.f32.gmra.mxu0 %v46_v23 }
  0x61   :  { %111 = vmatmul.f32.gmra.mxu0 %v47_v24 }
  0x69   :  { %114 = vmatmul.f32.gmra.mxu0 %v48_v25 }
  0x71   :  { %117 = vmatmul.f32.gmra.mxu0 %v49_v26 }
  0x79   :  { %120 = vmatmul.f32.gmra.mxu0 %v50_v27 }
  0x81   :  { %123 = vmatmul.f32.gmra.mxu0 %v51_v28 }
  0x89   :  { %126 = vmatmul.f32.gmra.mxu0 %v52_v29 }
  0x91   :  { %129 = vmatmul.f32.gmra.mxu0 %v53_v30 }
  0x99   :  { %132 = vmatmul.f32.gmra.mxu0 %v54_v31 }
  0x9e   :  { %v88_v32 = vpop.f32.mrf.mxu0 }
  0xa6   :  { %v91_v33 = vpop.f32.mrf.mxu0 }
  0xae   :  { %v94_v34 = vpop.f32.mrf.mxu0 }
  0xb6   :  { %v97_v35 = vpop.f32.mrf.mxu0 }
  0xbe   :  { %v100_v36 = vpop.f32.mrf.mxu0 }
  0xc6   :  { %v103_v37 = vpop.f32.mrf.mxu0 }
  0xce   :  { %v106_v38 = vpop.f32.mrf.mxu0 }
  0xd6   :  { %v109_v39 = vpop.f32.mrf.mxu0 }
  0xde   :  { %v112_v40 = vpop.f32.mrf.mxu0 }
  0xe6   :  { %v115_v41 = vpop.f32.mrf.mxu0 }
  0xee   :  { %v118_v42 = vpop.f32.mrf.mxu0 }
  0xf6   :  { %v121_v43 = vpop.f32.mrf.mxu0 }
  0xfe   :  { %v124_v44 = vpop.f32.mrf.mxu0 }
 0x106   :  { %v127_v45 = vpop.f32.mrf.mxu0 }
 0x10e   :  { %v130_v46 = vpop.f32.mrf.mxu0 }
 0x116   :  { %v133_v47 = vpop.f32.mrf.mxu0 }
 0x117   :  { %140 = vmatpush.msra.mxu1 %v133_v47 }
 0x119   :  { %141 = vmatpush.msra.mxu1 %v130_v46 }
 0x11b   :  { %142 = vmatpush.msra.mxu1 %v127_v45 }
 0x11d   :  { %143 = vmatpush.msra.mxu1 %v124_v44 }
 0x11f   :  { %144 = vmatpush.msra.mxu1 %v121_v43 }
 0x121   :  { %145 = vmatpush.msra.mxu1 %v118_v42 }
 0x123   :  { %146 = vmatpush.msra.mxu1 %v115_v41 }
 0x125   :  { %147 = vmatpush.msra.mxu1 %v112_v40 }
 0x127   :  { %148 = vmatpush.msra.mxu1 %v109_v39 }
 0x129   :  { %149 = vmatpush.msra.mxu1 %v106_v38 }
 0x12b   :  { %150 = vmatpush.msra.mxu1 %v103_v37 }
 0x12d   :  { %151 = vmatpush.msra.mxu1 %v100_v36 }
 0x12f   :  { %152 = vmatpush.msra.mxu1 %v97_v35 }
 0x131   :  { %153 = vmatpush.msra.mxu1 %v94_v34 }
 0x133   :  { %154 = vmatpush.msra.mxu1 %v91_v33 }
 0x135   :  { %155 = vmatpush.msra.mxu1 %v88_v32 }
 0x136   :  { %156 = vmatmul.f32.vlgmr.msra.gmra.mxu1 %v527_v48 }
 0x13e   :  { %159 = vmatmul.f32.gmra.mxu1 %v533_v49 }
 0x146   :  { %162 = vmatmul.f32.gmra.mxu1 %v539_v50 }
 0x14e   :  { %165 = vmatmul.f32.gmra.mxu1 %v545_v51 }
 0x156   :  { %168 = vmatmul.f32.gmra.mxu1 %v551_v52 }
 0x15e   :  { %171 = vmatmul.f32.gmra.mxu1 %v557_v53 }
 0x166   :  { %174 = vmatmul.f32.gmra.mxu1 %v563_v54 }
 0x16e   :  { %177 = vmatmul.f32.gmra.mxu1 %v569_v55 }
 0x176   :  { %180 = vmatmul.f32.gmra.mxu1 %v575_v56 }
 0x17e   :  { %183 = vmatmul.f32.gmra.mxu1 %v590_v60 }
 0x186   :  { %186 = vmatmul.f32.gmra.mxu1 %v608_v1 }
 0x18e   :  { %189 = vmatmul.f32.gmra.mxu1 %v626_v6 }
 0x196   :  { %192 = vmatmul.f32.gmra.mxu1 %v641_v10 }
 0x19e   :  { %195 = vmatmul.f32.gmra.mxu1 %v653_v13 }
 0x1a6   :  { %198 = vmatmul.f32.gmra.mxu1 %v659_v14 }
 0x1ae   :  { %201 = vmatmul.f32.gmra.mxu1 %v665_v15 }
 0x1b3   :  { %v157_v17 = vpop.f32.mrf.mxu1 }
 0x1b4   :  { %v158_v18 = vadd.f32 %v391_v16, %v157_v17 }
 0x1b6   :  { %v205_v19 = vmax.f32 %v158_v18, 0.0 }
 0x1b8   :  { %253 = vmatmul.f32.vlgmr.msra.gmra.mxu2 %v205_v19 }
 0x1bb   :  { %v160_v20 = vpop.f32.mrf.mxu1 }
 0x1bc   :  { %v161_v21 = vadd.f32 %v391_v16, %v160_v20 }
 0x1be   :  { %v206_v22 = vmax.f32 %v161_v21, 0.0 }
 0x1c0   :  { %256 = vmatmul.f32.gmra.mxu2 %v206_v22 }
 0x1c3   :  { %v163_v23 = vpop.f32.mrf.mxu1 }
 0x1c4   :  { %v164_v24 = vadd.f32 %v391_v16, %v163_v23 }
 0x1c6   :  { %v207_v25 = vmax.f32 %v164_v24, 0.0 }
 0x1c8   :  { %259 = vmatmul.f32.gmra.mxu2 %v207_v25 }
 0x1cb   :  { %v166_v26 = vpop.f32.mrf.mxu1 }
 0x1cc   :  { %v167_v27 = vadd.f32 %v391_v16, %v166_v26 }
 0x1ce   :  { %v208_v28 = vmax.f32 %v167_v27, 0.0 }
 0x1d0   :  { %262 = vmatmul.f32.gmra.mxu2 %v208_v28 }
 0x1d3   :  { %v169_v29 = vpop.f32.mrf.mxu1 }
 0x1d4   :  { %v170_v30 = vadd.f32 %v391_v16, %v169_v29 }
 0x1d6   :  { %v209_v31 = vmax.f32 %v170_v30, 0.0 }
 0x1d8   :  { %265 = vmatmul.f32.gmra.mxu2 %v209_v31 }
 0x1db   :  { %v172_v32 = vpop.f32.mrf.mxu1 }
 0x1dc   :  { %v173_v33 = vadd.f32 %v391_v16, %v172_v32 }
 0x1de   :  { %v210_v34 = vmax.f32 %v173_v33, 0.0 }
 0x1e0   :  { %268 = vmatmul.f32.gmra.mxu2 %v210_v34 }
 0x1e3   :  { %v175_v35 = vpop.f32.mrf.mxu1 }
 0x1e4   :  { %v176_v36 = vadd.f32 %v391_v16, %v175_v35 }
 0x1e6   :  { %v211_v37 = vmax.f32 %v176_v36, 0.0 }
 0x1e8   :  { %271 = vmatmul.f32.gmra.mxu2 %v211_v37 }
 0x1eb   :  { %v178_v38 = vpop.f32.mrf.mxu1 }
 0x1ec   :  { %v179_v39 = vadd.f32 %v391_v16, %v178_v38 }
 0x1ee   :  { %v212_v40 = vmax.f32 %v179_v39, 0.0 }
 0x1f0   :  { %274 = vmatmul.f32.gmra.mxu2 %v212_v40 }
 0x1f3   :  { %v181_v41 = vpop.f32.mrf.mxu1 }
 0x1f4   :  { %v182_v42 = vadd.f32 %v391_v16, %v181_v41 }
 0x1f6   :  { %v213_v43 = vmax.f32 %v182_v42, 0.0 }
 0x1f8   :  { %277 = vmatmul.f32.gmra.mxu2 %v213_v43 }
 0x1fb   :  { %v184_v44 = vpop.f32.mrf.mxu1 }
 0x1fc   :  { %v185_v45 = vadd.f32 %v391_v16, %v184_v44 }
 0x1fe   :  { %v214_v46 = vmax.f32 %v185_v45, 0.0 }
 0x200   :  { %280 = vmatmul.f32.gmra.mxu2 %v214_v46 }
 0x203   :  { %v187_v47 = vpop.f32.mrf.mxu1 }
 0x204   :  { %v188_v57 = vadd.f32 %v391_v16, %v187_v47 }
 0x206   :  { %v215_v58 = vmax.f32 %v188_v57, 0.0 }
 0x208   :  { %283 = vmatmul.f32.gmra.mxu2 %v215_v58 }
 0x20b   :  { %v190_v59 = vpop.f32.mrf.mxu1 }
 0x20c   :  { %v191_v61 = vadd.f32 %v391_v16, %v190_v59 }
 0x20e   :  { %v216_v62 = vmax.f32 %v191_v61, 0.0 }
 0x210   :  { %286 = vmatmul.f32.gmra.mxu2 %v216_v62 }
 0x213   :  { %v193_v63 = vpop.f32.mrf.mxu1 }
 0x214   :  { %v194_v0 = vadd.f32 %v391_v16, %v193_v63 }
 0x216   :  { %v217_v2 = vmax.f32 %v194_v0, 0.0 }
 0x218   :  { %289 = vmatmul.f32.gmra.mxu2 %v217_v2 }
 0x21b   :  { %v196_v3 = vpop.f32.mrf.mxu1 }
 0x21c   :  { %v197_v4 = vadd.f32 %v391_v16, %v196_v3 }
 0x21e   :  { %v218_v5 = vmax.f32 %v197_v4, 0.0 }
 0x220   :  { %292 = vmatmul.f32.gmra.mxu2 %v218_v5 }
 0x223   :  { %v199_v7 = vpop.f32.mrf.mxu1 }
 0x224   :  { %v200_v8 = vadd.f32 %v391_v16, %v199_v7 }
 0x226   :  { %v219_v9 = vmax.f32 %v200_v8, 0.0 }
 0x228   :  { %295 = vmatmul.f32.gmra.mxu2 %v219_v9 }
 0x22b   :  { %v202_v11 = vpop.f32.mrf.mxu1 }
 0x22c   :  { %v203_v12 = vadd.f32 %v391_v16, %v202_v11 }
 0x22e   :  { %v220_v17 = vmax.f32 %v203_v12, 0.0 }
 0x230   :  { %298 = vmatmul.f32.gmra.mxu2 %v220_v17 }
 0x23b   :  { %v254_v18 = vpop.f32.mrf.mxu2 }
 0x243   :  { %v257_v19 = vpop.f32.mrf.mxu2 }
 0x24b   :  { %v260_v20 = vpop.f32.mrf.mxu2 }
 0x253   :  { %v263_v21 = vpop.f32.mrf.mxu2 }
 0x25b   :  { %v266_v22 = vpop.f32.mrf.mxu2 }
 0x263   :  { %v269_v23 = vpop.f32.mrf.mxu2 }
 0x26b   :  { %v272_v24 = vpop.f32.mrf.mxu2 }
 0x273   :  { %v275_v25 = vpop.f32.mrf.mxu2 }
 0x27b   :  { %v278_v26 = vpop.f32.mrf.mxu2 }
 0x283   :  { %v281_v27 = vpop.f32.mrf.mxu2 }
 0x28b   :  { %v284_v28 = vpop.f32.mrf.mxu2 }
 0x293   :  { %v287_v29 = vpop.f32.mrf.mxu2 }
 0x29b   :  { %v290_v30 = vpop.f32.mrf.mxu2 }
 0x2a3   :  { %v293_v31 = vpop.f32.mrf.mxu2 }
 0x2ab   :  { %v296_v32 = vpop.f32.mrf.mxu2 }
 0x2b3   :  { %v299_v33 = vpop.f32.mrf.mxu2 }
 0x2b4   :  { %306 = vmatpush.msra.mxu3 %v299_v33 }
 0x2b6   :  { %307 = vmatpush.msra.mxu3 %v296_v32 }
 0x2b8   :  { %308 = vmatpush.msra.mxu3 %v293_v31 }
 0x2ba   :  { %309 = vmatpush.msra.mxu3 %v290_v30 }
 0x2bc   :  { %310 = vmatpush.msra.mxu3 %v287_v29 }
 0x2be   :  { %311 = vmatpush.msra.mxu3 %v284_v28 }
 0x2c0   :  { %312 = vmatpush.msra.mxu3 %v281_v27 }
 0x2c2   :  { %313 = vmatpush.msra.mxu3 %v278_v26 }
 0x2c4   :  { %314 = vmatpush.msra.mxu3 %v275_v25 }
 0x2c6   :  { %315 = vmatpush.msra.mxu3 %v272_v24 }
 0x2c8   :  { %316 = vmatpush.msra.mxu3 %v269_v23 }
 0x2ca   :  { %317 = vmatpush.msra.mxu3 %v266_v22 }
 0x2cc   :  { %318 = vmatpush.msra.mxu3 %v263_v21 }
 0x2ce   :  { %319 = vmatpush.msra.mxu3 %v260_v20 }
 0x2d0   :  { %320 = vmatpush.msra.mxu3 %v257_v19 }
 0x2d2   :  { %321 = vmatpush.msra.mxu3 %v254_v18 }
 0x2d3   :  { %322 = vmatmul.f32.vlgmr.msra.gmra.mxu3 %v527_v48  ;;  %v392_v48 = vld [vmem:[%s743_s5] ss:$0 sm:$0xff] }
 0x2db   :  { %325 = vmatmul.f32.gmra.mxu3 %v533_v49 }
 0x2e3   :  { %328 = vmatmul.f32.gmra.mxu3 %v539_v50 }
 0x2eb   :  { %331 = vmatmul.f32.gmra.mxu3 %v545_v51 }
 0x2f3   :  { %334 = vmatmul.f32.gmra.mxu3 %v551_v52 }
 0x2fb   :  { %337 = vmatmul.f32.gmra.mxu3 %v557_v53 }
 0x303   :  { %340 = vmatmul.f32.gmra.mxu3 %v563_v54 }
 0x30b   :  { %343 = vmatmul.f32.gmra.mxu3 %v569_v55 }
 0x313   :  { %346 = vmatmul.f32.gmra.mxu3 %v575_v56 }
 0x31b   :  { %349 = vmatmul.f32.gmra.mxu3 %v590_v60 }
 0x323   :  { %352 = vmatmul.f32.gmra.mxu3 %v608_v1 }
 0x32b   :  { %355 = vmatmul.f32.gmra.mxu3 %v626_v6 }
 0x333   :  { %358 = vmatmul.f32.gmra.mxu3 %v641_v10 }
 0x33b   :  { %361 = vmatmul.f32.gmra.mxu3 %v653_v13 }
 0x343   :  { %364 = vmatmul.f32.gmra.mxu3 %v659_v14 }
 0x34b   :  { %367 = vmatmul.f32.gmra.mxu3 %v665_v15 }
 0x356   :  { %v323_v49 = vpop.f32.mrf.mxu3 }
 0x357   :  { %v324_v50 = vadd.f32 %v392_v48, %v323_v49 }
 0x359   :  { %371 = vst [vmem:[%s744_s6] sm:$0xff] %v324_v50 }
 0x35e   :  { %v326_v51 = vpop.f32.mrf.mxu3 }
 0x35f   :  { %v327_v52 = vadd.f32 %v392_v48, %v326_v51 }
 0x361   :  { %372 = vst [vmem:[%s744_s6 + $0x8] sm:$0xff] %v327_v52 }
 0x366   :  { %v329_v53 = vpop.f32.mrf.mxu3 }
 0x367   :  { %v330_v54 = vadd.f32 %v392_v48, %v329_v53 }
 0x369   :  { %373 = vst [vmem:[%s744_s6 + $0x10] sm:$0xff] %v330_v54 }
 0x36e   :  { %v332_v55 = vpop.f32.mrf.mxu3 }
 0x36f   :  { %v333_v56 = vadd.f32 %v392_v48, %v332_v55 }
 0x371   :  { %374 = vst [vmem:[%s744_s6 + $0x18] sm:$0xff] %v333_v56 }
 0x376   :  { %v335_v60 = vpop.f32.mrf.mxu3 }
 0x377   :  { %v336_v1 = vadd.f32 %v392_v48, %v335_v60 }
 0x379   :  { %375 = vst [vmem:[%s744_s6 + $0x20] sm:$0xff] %v336_v1 }
 0x37e   :  { %v338_v6 = vpop.f32.mrf.mxu3 }
 0x37f   :  { %v339_v10 = vadd.f32 %v392_v48, %v338_v6 }
 0x381   :  { %376 = vst [vmem:[%s744_s6 + $0x28] sm:$0xff] %v339_v10 }
 0x386   :  { %v341_v13 = vpop.f32.mrf.mxu3 }
 0x387   :  { %v342_v14 = vadd.f32 %v392_v48, %v341_v13 }
 0x389   :  { %377 = vst [vmem:[%s744_s6 + $0x30] sm:$0xff] %v342_v14 }
 0x38e   :  { %v344_v15 = vpop.f32.mrf.mxu3 }
 0x38f   :  { %v345_v16 = vadd.f32 %v392_v48, %v344_v15 }
 0x391   :  { %378 = vst [vmem:[%s744_s6 + $0x38] sm:$0xff] %v345_v16 }
 0x396   :  { %v347_v34 = vpop.f32.mrf.mxu3 }
 0x397   :  { %v348_v35 = vadd.f32 %v392_v48, %v347_v34 }
 0x399   :  { %379 = vst [vmem:[%s744_s6 + $0x40] sm:$0xff] %v348_v35 }
 0x39e   :  { %v350_v36 = vpop.f32.mrf.mxu3 }
 0x39f   :  { %v351_v37 = vadd.f32 %v392_v48, %v350_v36 }
 0x3a1   :  { %380 = vst [vmem:[%s744_s6 + $0x48] sm:$0xff] %v351_v37 }
 0x3a6   :  { %v353_v38 = vpop.f32.mrf.mxu3 }
 0x3a7   :  { %v354_v39 = vadd.f32 %v392_v48, %v353_v38 }
 0x3a9   :  { %381 = vst [vmem:[%s744_s6 + $0x50] sm:$0xff] %v354_v39 }
 0x3ae   :  { %v356_v40 = vpop.f32.mrf.mxu3 }
 0x3af   :  { %v357_v41 = vadd.f32 %v392_v48, %v356_v40 }
 0x3b1   :  { %382 = vst [vmem:[%s744_s6 + $0x58] sm:$0xff] %v357_v41 }
 0x3b6   :  { %v359_v42 = vpop.f32.mrf.mxu3 }
 0x3b7   :  { %v360_v43 = vadd.f32 %v392_v48, %v359_v42 }
 0x3b9   :  { %383 = vst [vmem:[%s744_s6 + $0x60] sm:$0xff] %v360_v43 }
 0x3be   :  { %v362_v44 = vpop.f32.mrf.mxu3 }
 0x3bf   :  { %v363_v45 = vadd.f32 %v392_v48, %v362_v44 }
 0x3c1   :  { %384 = vst [vmem:[%s744_s6 + $0x68] sm:$0xff] %v363_v45 }
 0x3c6   :  { %v365_v46 = vpop.f32.mrf.mxu3 }
 0x3c7   :  { %v366_v47 = vadd.f32 %v392_v48, %v365_v46 }
 0x3c9   :  { %385 = vst [vmem:[%s744_s6 + $0x70] sm:$0xff] %v366_v47 }
 0x3ce   :  { %v368_v57 = vpop.f32.mrf.mxu3 }
 0x3cf   :  { %v369_v58 = vadd.f32 %v392_v48, %v368_v57 }
 0x3d1   :  { %386 = vst [vmem:[%s744_s6 + $0x78] sm:$0xff] %v369_v58 }

</bundles_post_ra>
